<compile_context>
chip_gen: v7x
topology: tpu7x:2x2x1
jax: 0.10.0
libtpu: 0.0.40
codegen_flags: <defaults>
</compile_context>

<pallas_src>
import functools

import jax
import jax.numpy as jnp
from jax.experimental import pallas as pl
from jax.experimental.pallas import tpu as pltpu

TB_DEFAULT = 8192  # batch tile (multiple of 8); VMEM working set stays small


def _round_up(x, m):
    return ((x + m - 1) // m) * m


def mlp_kernel(x_ref, w1_ref, b1_ref, w2_ref, b2_ref, o_ref):
    # Layer 1: Linear(d_in, 32) in f32 on the MXU (f32 accumulate).
    h = jnp.dot(x_ref[...], w1_ref[...], preferred_element_type=jnp.float32)
    h = jnp.maximum(h + b1_ref[...], 0.0)            # bias + ReLU on the VPU
    # Layer 2: Linear(32, d_out); store only the real d_out columns.
    y = jnp.dot(h, w2_ref[...], preferred_element_type=jnp.float32)
    o_ref[...] = (y + b2_ref[...]).astype(o_ref.dtype)


@functools.partial(jax.jit, static_argnames=("tb",))
def mlp_classifier(x, w1, b1, w2, b2, *, tb=TB_DEFAULT):
    """Pallas forward for MLPClassifier.

    x:  (B, d_in) float32
    w1: (d_in, 32), b1: (32,)
    w2: (32, d_out), b2: (d_out,)
    returns (B, d_out) float32
    """
    B, d_in = x.shape
    hidden = w1.shape[1]
    d_out = w2.shape[1]

    x = x.astype(jnp.float32)
    w1 = w1.astype(jnp.float32)
    w2 = w2.astype(jnp.float32)
    b1_r = b1.reshape(1, hidden).astype(jnp.float32)
    b2_r = b2.reshape(1, d_out).astype(jnp.float32)

    # --- batch tiling --------------------------------------------------------
    tb = max(8, _round_up(int(tb), 8))            # tile must be a multiple of 8
    half = _round_up(-(-B // 2), 8)               # >= 2 grid steps when B > 8
    tb = min(tb, max(half, 8))                    # -> both v7x TCs get work
    b_pad = _round_up(B, tb)
    if b_pad != B:
        x = jnp.pad(x, ((0, b_pad - B), (0, 0)))  # zero rows, sliced off below
    grid = (b_pad // tb,)

    flops = 2 * b_pad * (d_in * hidden + hidden * d_out)
    bytes_accessed = 4 * (b_pad * d_in + b_pad * d_out
                          + d_in * hidden + hidden + hidden * d_out + d_out)

    out = pl.pallas_call(
        mlp_kernel,
        out_shape=jax.ShapeDtypeStruct((b_pad, d_out), jnp.float32),
        grid_spec=pltpu.PrefetchScalarGridSpec(
            num_scalar_prefetch=0,
            grid=grid,
            in_specs=[
                # x tile streams over the batch axis (double-buffered by Pallas)
                pl.BlockSpec((tb, d_in), lambda i: (i, 0)),
                # weights / biases stay VMEM-resident (constant index maps)
                pl.BlockSpec((d_in, hidden), lambda i: (0, 0)),
                pl.BlockSpec((1, hidden), lambda i: (0, 0)),
                pl.BlockSpec((hidden, d_out), lambda i: (0, 0)),
                pl.BlockSpec((1, d_out), lambda i: (0, 0)),
            ],
            # un-padded output: block minor dim == full array dim
            out_specs=pl.BlockSpec((tb, d_out), lambda i: (i, 0)),
        ),
        compiler_params=pltpu.CompilerParams(
            dimension_semantics=("parallel",),          # shard batch over TCs
            vmem_limit_bytes=48 * 1024 * 1024,          # headroom on all gens
        ),
        cost_estimate=pl.CostEstimate(
            flops=flops, transcendentals=0, bytes_accessed=bytes_accessed),
    )(x, w1, b1_r, w2, b2_r)

    if b_pad != B:
        out = out[:B]          # only the batch padding; no lane padding left
    return out


def _reference(x, w1, b1, w2, b2):
    """Pure-JAX f32 reference (highest matmul precision)."""
    h = jnp.maximum(
        jnp.dot(x, w1, precision=jax.lax.Precision.HIGHEST) + b1, 0.0)
    return jnp.dot(h, w2, precision=jax.lax.Precision.HIGHEST) + b2


if __name__ == "__main__":
    # Small shapes consistent with the module: batch=8, input_dim=16,
    # hidden=32 (fixed by the module), output_dim=8.
    B, INPUT_DIM, OUTPUT_DIM = 8, 16, 8

    key = jax.random.PRNGKey(0)
    k_x, k_w1, k_b1, k_w2, k_b2 = jax.random.split(key, 5)

    x = jax.random.normal(k_x, (B, INPUT_DIM), dtype=jnp.float32)
    # Parameters already in (in, out) layout so the forward is y = x @ W + b.
    w1 = jax.random.normal(k_w1, (INPUT_DIM, 32), dtype=jnp.float32) * 0.1
    b1 = jax.random.normal(k_b1, (32,), dtype=jnp.float32) * 0.1
    w2 = jax.random.normal(k_w2, (32, OUTPUT_DIM), dtype=jnp.float32) * 0.1
    b2 = jax.random.normal(k_b2, (OUTPUT_DIM,), dtype=jnp.float32) * 0.1

    out = jax.block_until_ready(mlp_classifier(x, w1, b1, w2, b2))
    assert out.shape == (B, OUTPUT_DIM)
    ref = _reference(x, w1, b1, w2, b2)
    assert jnp.allclose(out, ref, atol=1e-2, rtol=1e-2), \
        float(jnp.max(jnp.abs(out - ref)))

    # Exercise the multi-tile path (grid > 1) with batch padding (40 % 16 != 0).
    B2 = 40
    x2 = jax.random.normal(jax.random.PRNGKey(1), (B2, INPUT_DIM), jnp.float32)
    out2 = jax.block_until_ready(mlp_classifier(x2, w1, b1, w2, b2, tb=16))
    ref2 = _reference(x2, w1, b1, w2, b2)
    assert out2.shape == (B2, OUTPUT_DIM)
    assert jnp.allclose(out2, ref2, atol=1e-2, rtol=1e-2), \
        float(jnp.max(jnp.abs(out2 - ref2)))

    print("KERNEL_OK")
</pallas_src>

<mosaic_0001>
module attributes {stable_mosaic.version = 11 : i64} {
  func.func @mlp_kernel(%arg0: i32, %arg1: memref<8x16xf32, #tpu.memory_space<vmem>>, %arg2: memref<16x32xf32, #tpu.memory_space<vmem>>, %arg3: memref<1x32xf32, #tpu.memory_space<vmem>>, %arg4: memref<32x8xf32, #tpu.memory_space<vmem>>, %arg5: memref<1x8xf32, #tpu.memory_space<vmem>>, %arg6: memref<8x8xf32, #tpu.memory_space<vmem>>) attributes {dimension_semantics = [#tpu.dimension_semantics<parallel>], iteration_bounds = array<i64: 1>, scalar_prefetch = 0 : i64, scratch_operands = 0 : i64, tpu.core_type = #tpu.core_type<tc>, window_params = [{transform_indices = @transform_0, window_bounds = array<i64: 8, 16>}, {pipeline_mode = #tpu.pipeline_mode<synchronous>, transform_indices = @transform_1, window_bounds = array<i64: 16, 32>}, {pipeline_mode = #tpu.pipeline_mode<synchronous>, transform_indices = @transform_2, window_bounds = array<i64: 1, 32>}, {pipeline_mode = #tpu.pipeline_mode<synchronous>, transform_indices = @transform_3, window_bounds = array<i64: 32, 8>}, {pipeline_mode = #tpu.pipeline_mode<synchronous>, transform_indices = @transform_4, window_bounds = array<i64: 1, 8>}, {transform_indices = @transform_5, window_bounds = array<i64: 8, 8>}]} {
    %c0 = arith.constant 0 : index
    %c0_0 = arith.constant 0 : index
    %0 = vector.load %arg1[%c0, %c0_0] : memref<8x16xf32, #tpu.memory_space<vmem>>, vector<8x16xf32>
    %c0_1 = arith.constant 0 : index
    %c0_2 = arith.constant 0 : index
    %1 = vector.load %arg2[%c0_1, %c0_2] : memref<16x32xf32, #tpu.memory_space<vmem>>, vector<16x32xf32>
    %cst = arith.constant dense<0.000000e+00> : vector<8x32xf32>
    %2 = tpu.matmul %0, %1, %cst {dimension_numbers = #tpu.dot_dimension_numbers<[1], [0], [0], [1], [0, 0, 1, 1], [], []>} : vector<8x16xf32>, vector<16x32xf32>, vector<8x32xf32> -> vector<8x32xf32>
    %c0_3 = arith.constant 0 : index
    %c0_4 = arith.constant 0 : index
    %3 = vector.load %arg3[%c0_3, %c0_4] : memref<1x32xf32, #tpu.memory_space<vmem>>, vector<1x32xf32>
    %4 = vector.broadcast %3 : vector<1x32xf32> to vector<8x32xf32>
    %5 = arith.addf %2, %4 : vector<8x32xf32>
    %cst_5 = arith.constant 0.000000e+00 : f32
    %6 = vector.broadcast %cst_5 : f32 to vector<8x32xf32>
    %7 = arith.maximumf %5, %6 : vector<8x32xf32>
    %c0_6 = arith.constant 0 : index
    %c0_7 = arith.constant 0 : index
    %8 = vector.load %arg4[%c0_6, %c0_7] : memref<32x8xf32, #tpu.memory_space<vmem>>, vector<32x8xf32>
    %cst_8 = arith.constant dense<0.000000e+00> : vector<8x8xf32>
    %9 = tpu.matmul %7, %8, %cst_8 {dimension_numbers = #tpu.dot_dimension_numbers<[1], [0], [0], [1], [0, 0, 1, 1], [], []>} : vector<8x32xf32>, vector<32x8xf32>, vector<8x8xf32> -> vector<8x8xf32>
    %c0_9 = arith.constant 0 : index
    %c0_10 = arith.constant 0 : index
    %10 = vector.load %arg5[%c0_9, %c0_10] : memref<1x8xf32, #tpu.memory_space<vmem>>, vector<1x8xf32>
    %11 = vector.broadcast %10 : vector<1x8xf32> to vector<8x8xf32>
    %12 = arith.addf %9, %11 : vector<8x8xf32>
    %c0_11 = arith.constant 0 : index
    %c0_12 = arith.constant 0 : index
    %13 = vector.load %arg6[%c0_11, %c0_12] : memref<8x8xf32, #tpu.memory_space<vmem>>, vector<8x8xf32>
    tpu.vector_store %arg6[%c0_11, %c0_12], %12 {strides = array<i32>} : memref<8x8xf32, #tpu.memory_space<vmem>>, vector<8x8xf32>,
    return
  }
  func.func @transform_0(%arg0: i32) -> (i32, i32) {
    %c0_i32 = arith.constant 0 : i32
    %c0_i32_0 = arith.constant 0 : i32
    return %arg0, %c0_i32 : i32, i32
  }
  func.func @transform_1(%arg0: i32) -> (i32, i32) {
    %c0_i32 = arith.constant 0 : i32
    %c0_i32_0 = arith.constant 0 : i32
    %c0_i32_1 = arith.constant 0 : i32
    return %c0_i32, %c0_i32_0 : i32, i32
  }
  func.func @transform_2(%arg0: i32) -> (i32, i32) {
    %c0_i32 = arith.constant 0 : i32
    %c0_i32_0 = arith.constant 0 : i32
    %c0_i32_1 = arith.constant 0 : i32
    return %c0_i32, %c0_i32_0 : i32, i32
  }
  func.func @transform_3(%arg0: i32) -> (i32, i32) {
    %c0_i32 = arith.constant 0 : i32
    %c0_i32_0 = arith.constant 0 : i32
    %c0_i32_1 = arith.constant 0 : i32
    return %c0_i32, %c0_i32_0 : i32, i32
  }
  func.func @transform_4(%arg0: i32) -> (i32, i32) {
    %c0_i32 = arith.constant 0 : i32
    %c0_i32_0 = arith.constant 0 : i32
    %c0_i32_1 = arith.constant 0 : i32
    return %c0_i32, %c0_i32_0 : i32, i32
  }
  func.func @transform_5(%arg0: i32) -> (i32, i32) {
    %c0_i32 = arith.constant 0 : i32
    %c0_i32_0 = arith.constant 0 : i32
    return %arg0, %c0_i32 : i32, i32
  }
}

</mosaic_0001>

<bundles_post_ra>
// kernel: mlp_classifier.1
= control target key start
LH: loop header
LB: loop body
LE: loop exit
PB: predicated region body
PF: predicated region fallthrough
CT: control target
= control target key end

     0   :  { %v274_v2 = vmov 0.0|0.0   ;;  %vm275_vm0 = vmmov 0   ;;  %v276_v4 = vmov 0.0   ;;  %s347_s0 = inlined_call_operand.vmem [shape: f32[8,16], index: 0, kind: input, shape index: {}]   ;;  %s348_s1 = inlined_call_operand.vmem [shape: f32[16,32], index: 1, kind: input, shape index: {}]   ;;  %s349_s2 = inlined_call_operand.vmem [shape: f32[1,32], index: 2, kind: input, shape index: {}]   ;;  %s350_s3 = inlined_call_operand.vmem [shape: f32[32,8], index: 3, kind: input, shape index: {}]   ;;  %s351_s4 = inlined_call_operand.vmem [shape: f32[1,8], index: 4, kind: input, shape index: {}]   ;;  %s352_s5 = inlined_call_operand.hbm [shape: f32[8,8], index: 5, kind: output, shape index: {}]  }
   0x1   :  { %v22_v0 = vld [vmem:[%s348_s1] sm:$0xff]  ;;  %v23_v1 = vld [vmem:[%s348_s1 + $0x8] sm:$0xff]  ;;  %237 = vmatprep.subr.bf16.mxu0 %v274_v2  ;;  %223 = vmatprep.mubr.msk.f32.mxu0 %vm275_vm0, %v276_v4 }
   0x2   :  { %v238_v3 = vpack.c.bf16 %v23_v1, %v22_v0  ;;  %v106_v5 = vld [vmem:[%s350_s3] sm:$0xff]  ;;  %v107_v6 = vld [vmem:[%s350_s3 + $0x8] sm:$0xff]  ;;  %240 = vmatprep.subr.bf16.mxu1 %v274_v2  ;;  %234 = vmatprep.mubr.msk.f32.mxu1 %vm275_vm0, %v276_v4 }
   0x3   :  { %v241_v7 = vpack.c.bf16 %v107_v6, %v106_v5 }
   0x4   :  { %10 = vsyncpa [#allocation3], 0  ;;  %239 = vmatpush3.bf16.msra.mxu0 %v238_v3  ;;  %v21_v8 = vld [vmem:[%s347_s0] sm:$0xff]  ;;  %vm31_vm1 = vcmask 130048   ;;  %v108_v9 = vld [vmem:[%s350_s3 + $0x10] sm:$0xff]  ;;  %vm117_vm2 = vcmask 261120  }
   0x5   :  { %242 = vmatpush3.bf16.msra.mxu1 %v241_v7  ;;  %v109_v10 = vld [vmem:[%s350_s3 + $0x18] sm:$0xff]  ;;  %v207_v12 = vld [vmem:[%s349_s2] ss:$0 sm:$0xff]  ;;  %s277_s9 = smov [#allocation2]   ;;  %vm191_vm3 = vcmask 64512  }
   0x6   :  { %243 = vmatprep.subr.bf16.mxu1 %v274_v2  ;;  %v244_v11 = vpack.c.bf16 %v109_v10, %v108_v9  ;;  %v209_v17 = vld [vmem:[%s351_s4] ss:$0 sm:$0xff]  ;;  %s199_s10 = sshll.u32 %s277_s9, 4  ;;  %s200_s10 = int_to_ptr.vmem [resolvable:$true] %s199_s10 }
   0x7   :  { %224 = vmatmul.mubr.msk.f32.vlgmr.msra.gmra.mrb[0].mxu0 %vm31_vm1, %v21_v8  ;;  %s250_s3 = scalar_lea.vmem %s200_s10, 128  ;;  %p255_p1 = scmp.lt.s32.totalorder %s200_s10, %s200_s10 }
   0x8   :  { %p251_p0 = scmp.ne.s32.totalorder %s200_s10, %s250_s3  ;;  %p256_p2 = scmp.lt.s32.totalorder %s250_s3, %s250_s3 }
   0x9   :  { %245 = vmatpush3.bf16.msra.mxu1 %v244_v11 }
   0xa   :  { %p257_p3 = por %p256_p2, %p255_p1 }
   0xc   :  { %p258_p4 = pnand %p257_p3, %p251_p0 }
  0xda   :  { %v101_v13 = vpop.f32.mrb[0].mxu0 }
  0xdb   :  { %v102_v14 = vadd.f32 %v207_v12, %v101_v13  ;;  %v225_v15 = vpop.f32.mrb[1].mxu0 }
  0xdd   :  { %v105_v16 = vmax.f32 %v102_v14, 0.0 }
  0xdf   :  { %235 = vmatmul.mubr.msk.f32.vlgmr.msra.gmra.mrb[0].mxu1 %vm117_vm2, %v105_v16 }
 0x1b2   :  { %v187_v18 = vpop.f32.mrb[0].mxu1 }
 0x1b3   :  { %v188_v19 = vadd.f32 %v209_v17, %v187_v18  ;;  %v236_v20 = vpop.f32.mrb[1].mxu1 }
 0x1b5   :  { %192 = vst.msk [vmem:[#allocation2] sm:$0xff] %vm191_vm3, %v188_v19 }
 0x1b6   :  { %261 = shalt.err (!%p258_p4)
}
 0x1b7   :  { %s262_s12 = scalar_lea.hbm %s352_s5, 128 }
 0x1b8   :  { %p263_p5 = scmp.ne.s32.totalorder %s352_s5, %s262_s12  ;;  %p266_p6 = scmp.lt.u32.totalorder %s262_s12, %s352_s5 }
 0x1ba   :  { %p268_p7 = pnand %p266_p6, %p263_p5 }
 0x1bc   :  { %271 = shalt.err (!%p268_p7)
}
 0x1bd   :  { %202 = dma.vmem_to_hbm [thread:$0]  %s200_s10, 128, %s352_s5, [#allocation3]  }
 0x1be   :  { %272 = dma.done.wait [#allocation3], 128  }
 0x1bf   :  { %273 = vsyncadd [#allocation3], 4294967168 }
 0x1c0   :  { %206 = vsyncpa [#allocation3], 1 }

</bundles_post_ra>
